<compile_context>
chip_gen: v5e
topology: v5e:2x2
jax: 0.10.0
libtpu: 0.0.40
codegen_flags: <defaults>
</compile_context>

<pallas_src>
import functools

import jax
import jax.numpy as jnp
from jax.experimental import pallas as pl
from jax.experimental.pallas import tpu as pltpu


def _round_up(n, m):
    return ((n + m - 1) // m) * m


def _tpu_tuning():
    """Generation-aware block-size / VMEM budgets."""
    vmem_cap = 64 << 20  # conservative default: smallest per-core VMEM (v7x)
    try:
        info = pltpu.get_tpu_info()
        vmem_cap = int(getattr(info, "vmem_capacity_bytes", vmem_cap))
    except Exception:
        pass
    if vmem_cap <= (64 << 20):
        # v7x-like: 2 TCs share the grid; leave ~12 MiB headroom for Mosaic.
        return dict(vmem_budget=max(vmem_cap - (12 << 20), 16 << 20),
                    min_grid_steps=8,
                    target_block_bytes=6 << 20)
    # v5e / v6e: single TC, 128 MiB VMEM -> big blocks, few grid steps.
    return dict(vmem_budget=max(min(vmem_cap, 128 << 20) - (28 << 20), 16 << 20),
                min_grid_steps=3,
                target_block_bytes=8 << 20)


def _mean_rows_kernel(x_ref, o_ref, acc_ref, *, inv_hw, hw, hw_tile, mask_tail):
    # x_ref: [row_tile, hw_tile] tile; o_ref: [row_tile, 1];
    # acc_ref: f32 [row_tile, 1] scratch accumulator (resident across k).
    k = pl.program_id(1)

    @pl.when(k == 0)
    def _():
        acc_ref[...] = jnp.zeros_like(acc_ref)

    x = x_ref[...].astype(jnp.float32)
    if mask_tail:
        # Zero lanes past the true H*W extent (over-read tail block).
        lane = jax.lax.broadcasted_iota(jnp.int32, x.shape, 1)
        x = jnp.where(k * hw_tile + lane < hw, x, 0.0)
    acc_ref[...] += jnp.sum(x, axis=-1, keepdims=True)

    @pl.when(k == pl.num_programs(1) - 1)
    def _():
        o_ref[...] = (acc_ref[...] * inv_hw).astype(o_ref.dtype)


def _choose_tiles(rows, hw, itemsize, tuning, row_tile=None, hw_tile=None):
    """Pick (row_tile, hw_tile, n_hw_tiles) respecting the VMEM budget."""
    padded_hw = _round_up(hw, 128)
    # One input block must fit under double buffering plus out/acc/scratch slack.
    max_in_block = max(8 * 128 * itemsize,
                       (tuning["vmem_budget"] - (4 << 20)) // 2)
    block_bytes = min(tuning["target_block_bytes"], max_in_block)
    min_steps = tuning["min_grid_steps"]

    if hw_tile is not None:
        hw_tile = min(_round_up(hw_tile, 128), padded_hw)
        if hw_tile >= padded_hw and padded_hw == hw:
            hw_tile = hw
    elif 8 * padded_hw * itemsize <= max_in_block:
        hw_tile = hw                      # whole reduction axis in one block
    else:
        # Thin-tall input: bound VMEM by tiling the reduction axis.
        hw_tile = max(128, (max_in_block // (8 * itemsize)) // 128 * 128)

    bytes_per_row = (padded_hw if hw_tile == hw else hw_tile) * itemsize

    if row_tile is not None:
        row_tile = max(8, _round_up(row_tile, 8))
    else:
        row_tile = max(8, (block_bytes // bytes_per_row) // 8 * 8)
        if rows > min_steps * 8:
            # Keep enough grid steps to feed both v7x TCs and still pipeline.
            row_tile = min(row_tile, max(8, (rows // min_steps) // 8 * 8))
    row_tile = min(row_tile, _round_up(rows, 8))
    # Never let a (possibly user-supplied) row_tile blow the VMEM budget.
    while row_tile > 8 and row_tile * bytes_per_row > max_in_block:
        row_tile -= 8

    n_hw = 1 if hw_tile == hw else pl.cdiv(hw, hw_tile)
    return row_tile, hw_tile, n_hw


def expression_global_avg_pool(x, *, row_tile=None, hw_tile=None,
                               force_pallas=False):
    """Pallas equivalent of Expression(lambda t: t.mean(dim=(2, 3)))."""
    B, C, H, W = x.shape
    rows, hw = B * C, H * W
    itemsize = jnp.dtype(x.dtype).itemsize

    # Small-hw rows become sub-512B DMA segments and tiny inputs are dominated
    # by launch/step overhead: XLA's native reduce is at least as fast there.
    if not force_pallas and (hw < 128 or rows * hw * itemsize < (1 << 20)):
        return jnp.mean(x, axis=(2, 3))

    x2 = x.reshape(rows, hw)
    tuning = _tpu_tuning()
    row_tile, hw_tile, n_hw = _choose_tiles(
        rows, hw, itemsize, tuning, row_tile=row_tile, hw_tile=hw_tile)
    n_rows = pl.cdiv(rows, row_tile)
    mask_tail = (hw_tile * n_hw) != hw

    # VMEM accounting: 2 input buffers + 2 (lane-padded) output buffers +
    # f32 accumulator + Mosaic scratch headroom, clamped to the per-generation
    # budget (the tile chooser already guarantees the fit).
    padded_hw_tile = _round_up(hw_tile, 128)
    in_block_bytes = row_tile * padded_hw_tile * itemsize
    out_block_bytes = row_tile * 128 * itemsize
    acc_bytes = row_tile * 128 * 4
    vmem_bytes = 2 * in_block_bytes + 2 * out_block_bytes + acc_bytes + (2 << 20)
    vmem_bytes = int(min(max(vmem_bytes, 16 << 20), tuning["vmem_budget"]))

    kernel = functools.partial(_mean_rows_kernel, inv_hw=1.0 / hw, hw=hw,
                               hw_tile=hw_tile, mask_tail=mask_tail)

    out = pl.pallas_call(
        kernel,
        out_shape=jax.ShapeDtypeStruct((rows, 1), x.dtype),
        grid_spec=pltpu.PrefetchScalarGridSpec(
            num_scalar_prefetch=0,
            grid=(n_rows, n_hw),
            in_specs=[pl.BlockSpec((row_tile, hw_tile), lambda i, k: (i, k))],
            out_specs=pl.BlockSpec((row_tile, 1), lambda i, k: (i, 0)),
            scratch_shapes=[pltpu.VMEM((row_tile, 1), jnp.float32)],
        ),
        compiler_params=pltpu.CompilerParams(
            dimension_semantics=("parallel", "arbitrary"),
            vmem_limit_bytes=vmem_bytes,
        ),
    )(x2)

    # Edge-block over-read rows never reach the caller: output is exactly
    # (rows, 1) and out-of-bounds stores are dropped by Pallas.
    return out[:, 0].reshape(B, C)


if __name__ == "__main__":
    key = jax.random.PRNGKey(0)
    k0, k1, k2, k3 = jax.random.split(key, 4)

    # 1) Canonical small CNN shape: exercises the Pallas path directly.
    x = jax.random.normal(k0, (2, 4, 16, 16), dtype=jnp.float32)
    y = jax.block_until_ready(expression_global_avg_pool(x, force_pallas=True))
    assert y.shape == (2, 4), y.shape
    assert jnp.allclose(y, jnp.mean(x, axis=(2, 3)), atol=1e-5, rtol=1e-5)

    # 2) Small-hw / tiny input -> dispatches to the XLA reduce fallback.
    x2 = jax.random.normal(k1, (3, 5, 7, 9), dtype=jnp.float32)
    y2 = jax.block_until_ready(expression_global_avg_pool(x2))
    assert y2.shape == (3, 5), y2.shape
    assert jnp.allclose(y2, jnp.mean(x2, axis=(2, 3)), atol=1e-5, rtol=1e-5)

    # 3) hw-tiled reduction path (grid over rows x hw, ragged hw tail masked).
    x3 = jax.random.normal(k2, (2, 8, 36, 36), dtype=jnp.float32)
    y3 = jax.block_until_ready(
        expression_global_avg_pool(x3, force_pallas=True, row_tile=8, hw_tile=512))
    assert y3.shape == (2, 8), y3.shape
    assert jnp.allclose(y3, jnp.mean(x3, axis=(2, 3)), atol=1e-5, rtol=1e-5)

    # 4) Ragged row count (B*C = 15, not a multiple of 8): masked writeback.
    x4 = jax.random.normal(k3, (3, 5, 16, 16), dtype=jnp.float32)
    y4 = jax.block_until_ready(expression_global_avg_pool(x4, force_pallas=True))
    assert y4.shape == (3, 5), y4.shape
    assert jnp.allclose(y4, jnp.mean(x4, axis=(2, 3)), atol=1e-5, rtol=1e-5)

    print("KERNEL_OK")
</pallas_src>

<mosaic_0001>
module attributes {stable_mosaic.version = 11 : i64} {
  func.func @_mean_rows_kernel(%arg0: i32, %arg1: i32, %arg2: memref<8x256xf32, #tpu.memory_space<vmem>>, %arg3: memref<8x1xf32, #tpu.memory_space<vmem>>, %arg4: memref<8x1xf32, #tpu.memory_space<vmem>>) attributes {dimension_semantics = [#tpu.dimension_semantics<parallel>, #tpu.dimension_semantics<arbitrary>], iteration_bounds = array<i64: 1, 1>, scalar_prefetch = 0 : i64, scratch_operands = 1 : i64, tpu.core_type = #tpu.core_type<tc>, window_params = [{transform_indices = @transform_0, window_bounds = array<i64: 8, 256>}, {transform_indices = @transform_1, window_bounds = array<i64: 8, 1>}]} {
    %c0_i32 = arith.constant 0 : i32
    %0 = arith.cmpi eq, %arg1, %c0_i32 : i32
    %1 = arith.extui %0 : i1 to i32
    %c0_i32_0 = arith.constant 0 : i32
    %2 = arith.cmpi ne, %1, %c0_i32_0 : i32
    scf.if %2 {
      %cst_8 = arith.constant 0.000000e+00 : f32
      %12 = vector.broadcast %cst_8 : f32 to vector<8x1xf32>
      %c0_9 = arith.constant 0 : index
      %c0_10 = arith.constant 0 : index
      %13 = vector.load %arg4[%c0_9, %c0_10] : memref<8x1xf32, #tpu.memory_space<vmem>>, vector<8x1xf32>
      tpu.vector_store %arg4[%c0_9, %c0_10], %12 {strides = array<i32>} : memref<8x1xf32, #tpu.memory_space<vmem>>, vector<8x1xf32>,
    } else {
    }
    %c0 = arith.constant 0 : index
    %c0_1 = arith.constant 0 : index
    %3 = vector.load %arg2[%c0, %c0_1] : memref<8x256xf32, #tpu.memory_space<vmem>>, vector<8x256xf32>
    %c0_2 = arith.constant 0 : index
    %c0_3 = arith.constant 0 : index
    %4 = vector.load %arg4[%c0_2, %c0_3] : memref<8x1xf32, #tpu.memory_space<vmem>>, vector<8x1xf32>
    %cst = arith.constant dense<0.000000e+00> : vector<8xf32>
    %5 = vector.multi_reduction <add>, %3, %cst [1] : vector<8x256xf32> to vector<8xf32>
    %6 = vector.shape_cast %5 : vector<8xf32> to vector<8x1xf32>
    %7 = arith.addf %4, %6 : vector<8x1xf32>
    %c0_4 = arith.constant 0 : index
    %c0_5 = arith.constant 0 : index
    %8 = vector.load %arg4[%c0_4, %c0_5] : memref<8x1xf32, #tpu.memory_space<vmem>>, vector<8x1xf32>
    tpu.vector_store %arg4[%c0_4, %c0_5], %7 {strides = array<i32>} : memref<8x1xf32, #tpu.memory_space<vmem>>, vector<8x1xf32>,
    %c0_i32_6 = arith.constant 0 : i32
    %9 = arith.cmpi eq, %arg1, %c0_i32_6 : i32
    %10 = arith.extui %9 : i1 to i32
    %c0_i32_7 = arith.constant 0 : i32
    %11 = arith.cmpi ne, %10, %c0_i32_7 : i32
    scf.if %11 {
      %c0_8 = arith.constant 0 : index
      %c0_9 = arith.constant 0 : index
      %12 = vector.load %arg4[%c0_8, %c0_9] : memref<8x1xf32, #tpu.memory_space<vmem>>, vector<8x1xf32>
      %cst_10 = arith.constant 3.906250e-03 : f32
      %13 = vector.broadcast %cst_10 : f32 to vector<8x1xf32>
      %14 = arith.mulf %12, %13 : vector<8x1xf32>
      %c0_11 = arith.constant 0 : index
      %c0_12 = arith.constant 0 : index
      %15 = vector.load %arg3[%c0_11, %c0_12] : memref<8x1xf32, #tpu.memory_space<vmem>>, vector<8x1xf32>
      tpu.vector_store %arg3[%c0_11, %c0_12], %14 {strides = array<i32>} : memref<8x1xf32, #tpu.memory_space<vmem>>, vector<8x1xf32>,
    } else {
    }
    return
  }
  func.func @transform_0(%arg0: i32, %arg1: i32) -> (i32, i32) {
    %c0_i32 = arith.constant 0 : i32
    return %arg0, %arg1 : i32, i32
  }
  func.func @transform_1(%arg0: i32, %arg1: i32) -> (i32, i32) {
    %c0_i32 = arith.constant 0 : i32
    %c0_i32_0 = arith.constant 0 : i32
    return %arg0, %c0_i32 : i32, i32
  }
}

</mosaic_0001>

<bundles_post_ra>
// kernel: tpu_custom_call.1
= control target key start
LH: loop header
LB: loop body
LE: loop exit
PB: predicated region body
PF: predicated region fallthrough
CT: control target
= control target key end

     0   :  { %6 = vsyncpa [#allocation4], 0  ;;  %s76_s9 = smov [#allocation3]   ;;  %s94_s0 = inlined_call_operand.hbm [shape: f32[8,256], index: 0, kind: input, shape index: {}]   ;;  %s95_s1 = inlined_call_operand.vmem [shape: f32[8,1], index: 1, kind: output, shape index: {}]  }
   0x1   :  { %s12_s8 = sshll.u32 %s94_s0, 4  ;;  %s14_s10 = sshll.u32 %s76_s9, 4  ;;  %s13_s8 = int_to_ptr.hbm [resolvable:$true] %s12_s8  ;;  %s15_s10 = int_to_ptr.vmem [resolvable:$true] %s14_s10 }
   0x2   :  { %17 = dma.hbm_to_vmem [thread:$0]  %s13_s8, 256, %s15_s10, [#allocation4]  }
   0x3   :  { %74 = dma.done.wait [#allocation4], 256  }
   0x4   :  { %75 = vsyncadd [#allocation4], 4294967040  ;;  %vm26_vm0 = vcmask 7168   ;;  %v77_v0 = vmov 0.0   ;;  %v28_v1 = vld [vmem:[#allocation3] sm:$0xff]  ;;  %v29_v2 = vld [vmem:[#allocation3 + $0x8] sm:$0xff] }
   0x5   :  { %27 = vst.msk [vmem:[#allocation2] sm:$0xff] %vm26_vm0, %v77_v0  ;;  %v31_v3 = vadd.f32 %v29_v2, %v28_v1 }
   0x7   :  { %32 = vadd.xlane.f32.xlu0 %v31_v3 }
   0xc   :  { %v30_v4 = vld [vmem:[#allocation2] sm:$0xff] }
  0x7a   :  { %v33_v5 = vpop.xlane.xlu0 %32 }
  0x7b   :  { %v34_v6 = vadd.f32 %v33_v5, %v30_v4 }
  0x7d   :  { %36 = vst.msk [vmem:[#allocation2] sm:$0xff] %vm26_vm0, %v34_v6 }
  0x84   :  { %v40_v7 = vld [vmem:[#allocation2] sm:$0xff] }
  0x85   :  { %v41_v8 = vmul.f32 0.00390625, %v40_v7 }
  0x87   :  { %42 = vst.msk [vmem:[%s95_s1] sm:$0xff] %vm26_vm0, %v41_v8 }
  0x88   :  { %47 = vsyncpa [#allocation4], 1 }

</bundles_post_ra>
